<compile_context>
chip_gen: v7x
topology: tpu7x:2x2x1
jax: 0.10.0
libtpu: 0.0.40
codegen_flags: <defaults>
</compile_context>

<pallas_src>
import jax
import jax.numpy as jnp
from jax.experimental import pallas as pl
from jax.experimental.pallas import tpu as pltpu


def _round_up(v, m):
    return ((v + m - 1) // m) * m


def _cdiv(a, b):
    return (a + b - 1) // b


def _vmem_capacity_bytes():
    try:
        return int(pltpu.get_tpu_info().vmem_capacity_bytes)
    except Exception:
        return 64 * 1024 * 1024  # conservative fallback (v7x per-core VMEM)


def _residual_ffn_kernel(x_ref, w1_ref, b1_ref, w2_ref, b2_ref, out_ref, acc_ref):
    # x_ref:  (TN, Dp) bf16   w1_ref: (Dp, TH) bf16   b1_ref: (1, TH) f32
    # w2_ref: (TH, Dp) bf16   b2_ref: (1, Dp) f32     out_ref: (TN, Dp) bf16
    # acc_ref: (TN, Dp) f32 scratch accumulator over the hidden-dim grid axis.
    k = pl.program_id(1)

    @pl.when(k == 0)
    def _():
        acc_ref[...] = jnp.zeros_like(acc_ref)

    x = x_ref[...]                                         # bf16 activations
    h = jnp.dot(x, w1_ref[...], preferred_element_type=jnp.float32)
    h = jnp.maximum(h + b1_ref[...], 0.0)                  # bias + ReLU in f32
    acc_ref[...] += jnp.dot(h.astype(jnp.bfloat16), w2_ref[...],
                            preferred_element_type=jnp.float32)

    @pl.when(k == pl.num_programs(1) - 1)
    def _():
        # Residual + second bias in one f32 pass, then cast to the I/O dtype.
        out_ref[...] = (x.astype(jnp.float32) + acc_ref[...]
                        + b2_ref[...]).astype(out_ref.dtype)


def make_residual_ffn(w1, b1, w2, b2, *, act_dtype=jnp.bfloat16,
                      max_tile_n=1024, max_tile_h=2048):
    """Pads + casts the FFN parameters ONCE; returns jitted apply(x)=x+FFN(x)."""
    D, H = w1.shape
    assert w2.shape == (H, D)

    Dp = _round_up(D, 128)
    Hp0 = _round_up(H, 128)

    vmem_cap = _vmem_capacity_bytes()
    budget = int(0.72 * vmem_cap)          # generation-aware working-set target

    def _h_tiling(cap):
        n_k = _cdiv(Hp0, cap)
        th = _round_up(_cdiv(Hp0, n_k), 128)
        return th, n_k * th                # (tile_h, padded H)

    def _vmem_need(tn, th):
        return (2 * tn * Dp * 2            # x tiles (bf16, double-buffered)
                + 2 * tn * Dp * 2          # out tiles (bf16, double-buffered)
                + 2 * Dp * th * 2          # W1 k-tiles (bf16, double-buffered)
                + 2 * th * Dp * 2          # W2 k-tiles (bf16, double-buffered)
                + 2 * th * 4 + 2 * Dp * 4  # b1 / b2 (f32)
                + tn * Dp * 4              # f32 accumulator scratch
                + tn * th * (4 + 2))       # hidden h in f32 + its bf16 MXU copy

    tile_h, Hp = _h_tiling(max_tile_h)
    tile_n = max_tile_n
    while _vmem_need(tile_n, tile_h) > budget and tile_h > 128:
        tile_h, Hp = _h_tiling(max(128, tile_h // 2))
    while _vmem_need(tile_n, tile_h) > budget and tile_n > 128:
        tile_n //= 2

    # One-time parameter pad + cast (NOT in the per-call hot path).
    w1p = jnp.pad(w1, ((0, Dp - D), (0, Hp - H))).astype(jnp.bfloat16)
    b1p = jnp.pad(b1.reshape(1, -1), ((0, 0), (0, Hp - H))).astype(jnp.float32)
    w2p = jnp.pad(w2, ((0, Hp - H), (0, Dp - D))).astype(jnp.bfloat16)
    b2p = jnp.pad(b2.reshape(1, -1), ((0, 0), (0, Dp - D))).astype(jnp.float32)

    vmem_limit = min(int(0.85 * vmem_cap),
                     max(2 * _vmem_need(tile_n, tile_h), 16 * 1024 * 1024))

    @jax.jit
    def apply(x):
        N, Dx = x.shape
        assert Dx == D
        # v7x: >= 2 row steps per TensorCore (grid >= 4) when N allows;
        # otherwise the biggest VMEM-budgeted tile.
        tn = min(tile_n, max(128, _round_up(_cdiv(N, 4), 8)), _round_up(N, 8))
        Np = _round_up(N, tn)

        xp = x.astype(act_dtype)
        if Np != N or Dp != D:
            # TODO(synk): x row/feature padding ideally lives in the producer.
            xp = jnp.pad(xp, ((0, Np - N), (0, Dp - D)))

        grid = (Np // tn, Hp // tile_h)
        out = pl.pallas_call(
            _residual_ffn_kernel,
            out_shape=jax.ShapeDtypeStruct((Np, Dp), act_dtype),
            grid_spec=pltpu.PrefetchScalarGridSpec(
                num_scalar_prefetch=0,
                grid=grid,
                in_specs=[
                    pl.BlockSpec((tn, Dp), lambda i, k: (i, 0)),      # x tile
                    pl.BlockSpec((Dp, tile_h), lambda i, k: (0, k)),  # W1 cols
                    pl.BlockSpec((1, tile_h), lambda i, k: (0, k)),   # b1 tile
                    pl.BlockSpec((tile_h, Dp), lambda i, k: (k, 0)),  # W2 rows
                    pl.BlockSpec((1, Dp), lambda i, k: (0, 0)),       # b2
                ],
                out_specs=pl.BlockSpec((tn, Dp), lambda i, k: (i, 0)),
                scratch_shapes=[pltpu.VMEM((tn, Dp), jnp.float32)],
            ),
            compiler_params=pltpu.CompilerParams(
                dimension_semantics=("parallel", "arbitrary"),
                vmem_limit_bytes=vmem_limit,
            ),
        )(xp, w1p, b1p, w2p, b2p)

        if Np != N or Dp != D:
            out = out[:N, :D]
        return out

    return apply


def _reference(x, w1, b1, w2, b2):
    # Mirrors the kernel numerics: bf16 MXU inputs, f32 accumulation,
    # f32 bias/ReLU/residual, bf16 output.
    xf = x.astype(jnp.float32)
    h = jnp.dot(x.astype(jnp.bfloat16), w1.astype(jnp.bfloat16),
                preferred_element_type=jnp.float32) + b1.reshape(1, -1)
    h = jnp.maximum(h, 0.0)
    res = jnp.dot(h.astype(jnp.bfloat16), w2.astype(jnp.bfloat16),
                  preferred_element_type=jnp.float32) + b2.reshape(1, -1)
    return (xf + res).astype(x.dtype)


if __name__ == "__main__":
    # Lane-aligned, pipeline-friendly demo sizes: 512 nodes, D=128, H=256.
    # (Row grid of 4 -> double-buffered DMAs and 2 steps per v7x TensorCore.)
    N, D, H = 512, 128, 256

    key = jax.random.PRNGKey(0)
    kx, kw1, kb1, kw2, kb2 = jax.random.split(key, 5)

    # bf16 activations in HBM; parameters are deterministic synthetic values
    # (the wrapper accepts arbitrary inner modules).
    x = jax.random.normal(kx, (N, D), dtype=jnp.float32).astype(jnp.bfloat16)
    w1 = jax.random.normal(kw1, (D, H), dtype=jnp.float32) * (1.0 / D ** 0.5)
    b1 = jax.random.normal(kb1, (H,), dtype=jnp.float32) * 0.01
    w2 = jax.random.normal(kw2, (H, D), dtype=jnp.float32) * (1.0 / H ** 0.5)
    b2 = jax.random.normal(kb2, (D,), dtype=jnp.float32) * 0.01

    residual_ffn = make_residual_ffn(w1, b1, w2, b2)   # one-time pad/cast
    out = jax.block_until_ready(residual_ffn(x))

    ref = _reference(x, w1, b1, w2, b2)
    assert out.shape == (N, D) and out.dtype == jnp.bfloat16
    assert jnp.allclose(out.astype(jnp.float32), ref.astype(jnp.float32),
                        atol=3e-2, rtol=3e-2), "mismatch vs reference"

    # TODO(synk): the generic wrapper accepts arbitrary inner modules (incl.
    # graph-dependent ones); only a graph-agnostic FFN inner block is fused here.
    print("KERNEL_OK")
</pallas_src>

<mosaic_0001>
module attributes {stable_mosaic.version = 11 : i64} {
  func.func @_residual_ffn_kernel(%arg0: i32, %arg1: i32, %arg2: memref<128x128xbf16, #tpu.memory_space<vmem>>, %arg3: memref<128x256xbf16, #tpu.memory_space<vmem>>, %arg4: memref<1x256xf32, #tpu.memory_space<vmem>>, %arg5: memref<256x128xbf16, #tpu.memory_space<vmem>>, %arg6: memref<1x128xf32, #tpu.memory_space<vmem>>, %arg7: memref<128x128xbf16, #tpu.memory_space<vmem>>, %arg8: memref<128x128xf32, #tpu.memory_space<vmem>>) attributes {dimension_semantics = [#tpu.dimension_semantics<parallel>, #tpu.dimension_semantics<arbitrary>], iteration_bounds = array<i64: 4, 1>, scalar_prefetch = 0 : i64, scratch_operands = 1 : i64, tpu.core_type = #tpu.core_type<tc>, window_params = [{transform_indices = @transform_0, window_bounds = array<i64: 128, 128>}, {transform_indices = @transform_1, window_bounds = array<i64: 128, 256>}, {transform_indices = @transform_2, window_bounds = array<i64: 1, 256>}, {transform_indices = @transform_3, window_bounds = array<i64: 256, 128>}, {pipeline_mode = #tpu.pipeline_mode<synchronous>, transform_indices = @transform_4, window_bounds = array<i64: 1, 128>}, {transform_indices = @transform_5, window_bounds = array<i64: 128, 128>}]} {
    %c0_i32 = arith.constant 0 : i32
    %0 = arith.cmpi eq, %arg1, %c0_i32 : i32
    %1 = arith.extui %0 : i1 to i32
    %c0_i32_0 = arith.constant 0 : i32
    %2 = arith.cmpi ne, %1, %c0_i32_0 : i32
    scf.if %2 {
      %cst_16 = arith.constant 0.000000e+00 : f32
      %20 = vector.broadcast %cst_16 : f32 to vector<128x128xf32>
      %c0_17 = arith.constant 0 : index
      %c0_18 = arith.constant 0 : index
      %21 = vector.load %arg8[%c0_17, %c0_18] : memref<128x128xf32, #tpu.memory_space<vmem>>, vector<128x128xf32>
      tpu.vector_store %arg8[%c0_17, %c0_18], %20 {strides = array<i32>} : memref<128x128xf32, #tpu.memory_space<vmem>>, vector<128x128xf32>,
    } else {
    }
    %c0 = arith.constant 0 : index
    %c0_1 = arith.constant 0 : index
    %3 = vector.load %arg2[%c0, %c0_1] : memref<128x128xbf16, #tpu.memory_space<vmem>>, vector<128x128xbf16>
    %c0_2 = arith.constant 0 : index
    %c0_3 = arith.constant 0 : index
    %4 = vector.load %arg3[%c0_2, %c0_3] : memref<128x256xbf16, #tpu.memory_space<vmem>>, vector<128x256xbf16>
    %cst = arith.constant dense<0.000000e+00> : vector<128x256xf32>
    %5 = tpu.matmul %3, %4, %cst {dimension_numbers = #tpu.dot_dimension_numbers<[1], [0], [0], [1], [0, 0, 1, 1], [], []>} : vector<128x128xbf16>, vector<128x256xbf16>, vector<128x256xf32> -> vector<128x256xf32>
    %c0_4 = arith.constant 0 : index
    %c0_5 = arith.constant 0 : index
    %6 = vector.load %arg4[%c0_4, %c0_5] : memref<1x256xf32, #tpu.memory_space<vmem>>, vector<1x256xf32>
    %7 = vector.broadcast %6 : vector<1x256xf32> to vector<128x256xf32>
    %8 = arith.addf %5, %7 : vector<128x256xf32>
    %cst_6 = arith.constant 0.000000e+00 : f32
    %9 = vector.broadcast %cst_6 : f32 to vector<128x256xf32>
    %10 = arith.maximumf %8, %9 : vector<128x256xf32>
    %c0_7 = arith.constant 0 : index
    %c0_8 = arith.constant 0 : index
    %11 = vector.load %arg8[%c0_7, %c0_8] : memref<128x128xf32, #tpu.memory_space<vmem>>, vector<128x128xf32>
    %12 = arith.truncf %10 : vector<128x256xf32> to vector<128x256xbf16>
    %c0_9 = arith.constant 0 : index
    %c0_10 = arith.constant 0 : index
    %13 = vector.load %arg5[%c0_9, %c0_10] : memref<256x128xbf16, #tpu.memory_space<vmem>>, vector<256x128xbf16>
    %cst_11 = arith.constant dense<0.000000e+00> : vector<128x128xf32>
    %14 = tpu.matmul %12, %13, %cst_11 {dimension_numbers = #tpu.dot_dimension_numbers<[1], [0], [0], [1], [0, 0, 1, 1], [], []>} : vector<128x256xbf16>, vector<256x128xbf16>, vector<128x128xf32> -> vector<128x128xf32>
    %15 = arith.addf %11, %14 : vector<128x128xf32>
    %c0_12 = arith.constant 0 : index
    %c0_13 = arith.constant 0 : index
    %16 = vector.load %arg8[%c0_12, %c0_13] : memref<128x128xf32, #tpu.memory_space<vmem>>, vector<128x128xf32>
    tpu.vector_store %arg8[%c0_12, %c0_13], %15 {strides = array<i32>} : memref<128x128xf32, #tpu.memory_space<vmem>>, vector<128x128xf32>,
    %c0_i32_14 = arith.constant 0 : i32
    %17 = arith.cmpi eq, %arg1, %c0_i32_14 : i32
    %18 = arith.extui %17 : i1 to i32
    %c0_i32_15 = arith.constant 0 : i32
    %19 = arith.cmpi ne, %18, %c0_i32_15 : i32
    scf.if %19 {
      %20 = arith.extf %3 : vector<128x128xbf16> to vector<128x128xf32>
      %c0_16 = arith.constant 0 : index
      %c0_17 = arith.constant 0 : index
      %21 = vector.load %arg8[%c0_16, %c0_17] : memref<128x128xf32, #tpu.memory_space<vmem>>, vector<128x128xf32>
      %22 = arith.addf %20, %21 : vector<128x128xf32>
      %c0_18 = arith.constant 0 : index
      %c0_19 = arith.constant 0 : index
      %23 = vector.load %arg6[%c0_18, %c0_19] : memref<1x128xf32, #tpu.memory_space<vmem>>, vector<1x128xf32>
      %24 = vector.broadcast %23 : vector<1x128xf32> to vector<128x128xf32>
      %25 = arith.addf %22, %24 : vector<128x128xf32>
      %26 = arith.truncf %25 : vector<128x128xf32> to vector<128x128xbf16>
      %c0_20 = arith.constant 0 : index
      %c0_21 = arith.constant 0 : index
      %27 = vector.load %arg7[%c0_20, %c0_21] : memref<128x128xbf16, #tpu.memory_space<vmem>>, vector<128x128xbf16>
      tpu.vector_store %arg7[%c0_20, %c0_21], %26 {strides = array<i32>} : memref<128x128xbf16, #tpu.memory_space<vmem>>, vector<128x128xbf16>,
    } else {
    }
    return
  }
  func.func @transform_0(%arg0: i32, %arg1: i32) -> (i32, i32) {
    %c0_i32 = arith.constant 0 : i32
    %c0_i32_0 = arith.constant 0 : i32
    return %arg0, %c0_i32 : i32, i32
  }
  func.func @transform_1(%arg0: i32, %arg1: i32) -> (i32, i32) {
    %c0_i32 = arith.constant 0 : i32
    %c0_i32_0 = arith.constant 0 : i32
    return %c0_i32, %arg1 : i32, i32
  }
  func.func @transform_2(%arg0: i32, %arg1: i32) -> (i32, i32) {
    %c0_i32 = arith.constant 0 : i32
    %c0_i32_0 = arith.constant 0 : i32
    return %c0_i32, %arg1 : i32, i32
  }
  func.func @transform_3(%arg0: i32, %arg1: i32) -> (i32, i32) {
    %c0_i32 = arith.constant 0 : i32
    %c0_i32_0 = arith.constant 0 : i32
    return %arg1, %c0_i32 : i32, i32
  }
  func.func @transform_4(%arg0: i32, %arg1: i32) -> (i32, i32) {
    %c0_i32 = arith.constant 0 : i32
    %c0_i32_0 = arith.constant 0 : i32
    %c0_i32_1 = arith.constant 0 : i32
    return %c0_i32, %c0_i32_0 : i32, i32
  }
  func.func @transform_5(%arg0: i32, %arg1: i32) -> (i32, i32) {
    %c0_i32 = arith.constant 0 : i32
    %c0_i32_0 = arith.constant 0 : i32
    return %arg0, %c0_i32 : i32, i32
  }
}

</mosaic_0001>

<bundles_post_ra>
// kernel: apply.1
= control target key start
LH: loop header
LB: loop body
LE: loop exit
PB: predicated region body
PF: predicated region fallthrough
CT: control target
= control target key end

     0   :  { %10 = vsyncpa [#allocation4], 0  ;;  %s2020_s0 = inlined_call_operand.vmem [shape: bf16[512,128], index: 0, kind: input, shape index: {}]   ;;  %s2021_s1 = inlined_call_operand.vmem [shape: bf16[128,256], index: 1, kind: input, shape index: {}]   ;;  %s2022_s2 = inlined_call_operand.vmem [shape: f32[1,256], index: 2, kind: input, shape index: {}]   ;;  %s2023_s3 = inlined_call_operand.hbm [shape: bf16[256,128], index: 3, kind: input, shape index: {}]   ;;  %s2024_s4 = inlined_call_operand.vmem [shape: f32[1,128], index: 4, kind: input, shape index: {}]   ;;  %s2025_s5 = inlined_call_operand.hbm [shape: bf16[512,128], index: 5, kind: output, shape index: {}]  }
   0x1   :  { %11 = vsyncpa [#allocation5], 0 }
   0x2   :  { %13 = vsyncpa [#allocation5 + $0x1], 0  ;;  %s1687_s18 = smov 0   ;;  %s1689_s19 = smov 0  }
   0x3   :  { %s1691_s20 = smov 0   ;;  %s1693_s21 = smov 0  }
   0x4   :  { %s1695_s22 = smov 0   ;;  %s1697_s23 = smov 0  }
   0x5 LB: > { %s1209_s24 = sadd.s32 4294967295, %s1648_s23   ;;  %s1210_s25 = sadd.s32 4294967294, %s1648_s23   ;;  %s1648_s23 = sphi %s1697_s23, %s19_s23   ;;  %s1644_s22 = sphi %s1695_s22, %s2043_s22   ;;  %s1640_s21 = sphi %s1693_s21, %s2042_s21   ;;  %s1636_s20 = sphi %s1691_s20, %s2041_s20   ;;  %s1632_s19 = sphi %s1689_s19, %s2040_s19   ;;  %s1628_s18 = sphi %s1687_s18, %s2039_s18  }
   0x6   : > { %s31_s26 = sadd.s32 1, %s1644_s22  ;;  %s163_s27 = sadd.s32 1, %s1636_s20 }
   0x7   : > { %p33_p0 = scmp.ge.s32.totalorder %s31_s26, 4  ;;  %p173_p1 = scmp.ne.s32.totalorder %s1636_s20, %s1632_s19 }
   0x8   : > { %p174_p2 = scmp.eq.s32.totalorder %s1209_s24, 3  ;;  %p179_p3 = scmp.ne.s32.totalorder %s1632_s19, %s1628_s18 }
   0x9   : > { %s2045_s26 = smov (%p33_p0, %s31_s26), 0  ;;  %p180_p5 = scmp.eq.s32.totalorder %s1210_s25, 3 }
   0xa   : > { %p1727_p4 = por %p174_p2, %p173_p1  ;;  %s160_s29 = ssub.s32 %s1644_s22, %s2045_s26 }
   0xb   : > { %p1211_p6 = scmp.ge.s32.totalorder %s1648_s23, 1  ;;  %p161_p7 = scmp.eq.s32.totalorder %s160_s29, 0 }
   0xc   : > { %s2030_s28 = scalar_select %p1727_p4, 1, 0 }
   0xd   : > { %p1734_p8 = por %p180_p5, %p179_p3  ;;  %p187_p9 = scmp.lt.s32.totalorder %s1648_s23, 5 }
   0xe   : > { %s1740_s6 = scalar_select %p161_p7, %s1636_s20, %s163_s27  }
   0xf   : > { %s2031_s30 = scalar_select %p1734_p8, 1, 0 }
  0x10   : > { %p1742_p10 = pnand %p1211_p6, %p187_p9  ;;  %p1746_p11 = scmp.eq.s32.totalorder %s1209_s24, 0 }
  0x11   : > { %s1650_s9 = smov [#allocation3]   ;;  %s1538_s14 = scalar_lea.hbm %s2023_s3, 2048 }
  0x12   : > { %s2032_s7 = scalar_select %p1742_p10, 1, 0 }
  0x13   : > { %s2033_s8 = scalar_select %p1746_p11, 1, 0 }
  0x14   : > { %p1417_p12 = pneg %p1742_p10  ;;  %s219_s10 = sshll.u32 %s1650_s9, 4  ;;  %s220_s10 = int_to_ptr.vmem [resolvable:$true] %s219_s10 }
  0x15   : > { %p1539_p0 = scmp.ne.s32.totalorder %s2023_s3, %s1538_s14  ;;  %p1545_p5 = scmp.lt.u32.totalorder %s1538_s14, %s2023_s3 }
  0x16   : > { %p1754_p13 = pnand %p1746_p11, %p1417_p12 }
  0x18   : > { %p1540_p1 = pneg %p1754_p13 }
  0x1a   : > { %p1541_p2 = pnand %p1540_p1, %p1539_p0 }
  0x1c   : > { %p1542_p3 = pneg %p1541_p2 }
  0x1e   : > { %p1547_p6 = pnand %p1545_p5, %p1542_p3 }
  0x20   : > { %1550 = shalt.err (!%p1547_p6)
}
  0x21   : > { %s1551_s25 = scalar_lea.vmem %s220_s10, 2048  ;;  %p1559_p8 = scmp.lt.s32.totalorder %s220_s10, %s220_s10 }
  0x22   : > { %p1552_p7 = scmp.ne.s32.totalorder %s220_s10, %s1551_s25  ;;  %p1560_p4 = scmp.lt.s32.totalorder %s1551_s25, %s1551_s25 }
  0x24   : > { %p1554_p9 = pnand %p1552_p7, %p1540_p1  ;;  %p1561_p11 = por %p1560_p4, %p1559_p8 }
  0x26   : > { %p1555_p12 = pneg %p1554_p9 }
  0x28   : > { %p1562_p10 = pnand %p1561_p11, %p1555_p12 }
  0x2a   : > { %1565 = shalt.err (!%p1562_p10)
}
  0x2b   : > { %s1651_s27 = smov 64   ;;  %s1652_s29 = smov 4  }
  0x2c   : > { %1420 = dma.hbm_to_vmem [thread:$0]  (!%p1754_p13), %s2023_s3, 2048, %s220_s10, [#allocation4], %s1651_s27, %s1651_s27, %s1652_s29  }
  0x2d   : > { %p2035_p0 = scmp.ne.s32.totalorder %s2032_s7, 0 }
  0x2e   : > { %p2036_p2 = scmp.ne.s32.totalorder (!%p2035_p0), %s2033_s8, 0 }
  0x2f   : > { %247 = sbr.rel (%p2035_p0) target bundleno = 604 (0x25c), region = 40 }
  0x36   : > { %1619 = dma.done.wait (%p2036_p2), [#allocation4], 2048  }
  0x37   : > { %1621 = vsyncadd (%p2036_p2), [#allocation4], 4294965248  ;;  %v1653_v0 = vmov 0   ;;  %v1482_v1 = vld [vmem:[%s2021_s1 + $0x4] ss:$8 sps:$4 sm:$0xff]   ;;  %s1219_s29 = sshll.u32 %s1640_s21, 4  ;;  %v358_v41 = vlaneseq }
  0x38   : > { %528 = vmatprep.mubr.bf16.mxu0 %v1653_v0  ;;  %v1484_v2 = vld [vmem:[%s2021_s1] ss:$8 sps:$4 sm:$0xff]   ;;  %496 = vmatprep.subr.bf16.mxu0 %v1482_v1  ;;  %v1485_v3 = vld [vmem:[%s2021_s1 + $0x14] ss:$8 sps:$4 sm:$0xff]   ;;  %v1487_v4 = vld [vmem:[%s2021_s1 + $0x10] ss:$8 sps:$4 sm:$0xff]  }
  0x39   : > { %497 = vmatpush1.bf16.msra.mxu0 %v1484_v2  ;;  %v1488_v5 = vld [vmem:[%s2021_s1 + $0x24] ss:$8 sps:$4 sm:$0xff]   ;;  %v1490_v6 = vld [vmem:[%s2021_s1 + $0x20] ss:$8 sps:$4 sm:$0xff]   ;;  %v1491_v7 = vld [vmem:[%s2021_s1 + $0x34] ss:$8 sps:$4 sm:$0xff]  }
  0x3a   : > { %498 = vmatprep.subr.bf16.mxu0 %v1485_v3  ;;  %p285_p4 = scmp.lt.s32.totalorder %s1219_s29, 63  ;;  %v1493_v8 = vld [vmem:[%s2021_s1 + $0x30] ss:$8 sps:$4 sm:$0xff]   ;;  %v1494_v9 = vld [vmem:[%s2021_s1 + $0x44] ss:$8 sps:$4 sm:$0xff]   ;;  %v359_v42 = vshrl.u32 %v358_v41, 7 }
  0x3b   : > { %v1496_v10 = vld [vmem:[%s2021_s1 + $0x40] ss:$8 sps:$4 sm:$0xff]   ;;  %v1497_v11 = vld [vmem:[%s2021_s1 + $0x54] ss:$8 sps:$4 sm:$0xff]   ;;  %v1499_v17 = vld [vmem:[%s2021_s1 + $0x50] ss:$8 sps:$4 sm:$0xff]  }
  0x3c   : > { %s2047_s29 = smov (!%p285_p4, %s1219_s29), 63  ;;  %v1514_v12 = vld [vmem:[#allocation3 + $0x40] sm:$0xff]   ;;  %v1516_v14 = vld [vmem:[#allocation3 + $0x48] sm:$0xff]   ;;  %v1518_v16 = vld [vmem:[#allocation3 + $0x50] sm:$0xff]   ;;  %v360_v43 = vsub.s32 0, %v359_v42  ;;  %v364_v45 = vsub.s32 1, %v359_v42 }
  0x3d   : > { %499 = vmatpush1.bf16.msra.mxu0 %v1487_v4  ;;  %v1515_v13 = vld [vmem:[#allocation3] sm:$0xff]   ;;  %1347 = vmatprep.subr.bf16.mxu1 %v1514_v12  ;;  %v1517_v15 = vld [vmem:[#allocation3 + $0x8] sm:$0xff]   ;;  %s1220_s17 = sshll.u32 %s2047_s29, 2  ;;  %v1519_v20 = vld [vmem:[#allocation3 + $0x10] sm:$0xff]   ;;  %s281_s24 = sand.u32 1, %s1632_s19  }
  0x3e   : > { %500 = vmatprep.subr.bf16.mxu0 %v1488_v5  ;;  %1348 = vmatpush3.bf16.msra.mxu1 %v1515_v13  ;;  %v1500_v18 = vld [vmem:[%s2021_s1 + $0x64] ss:$8 sps:$4 sm:$0xff]   ;;  %v1502_v19 = vld [vmem:[%s2021_s1 + $0x60] ss:$8 sps:$4 sm:$0xff]   ;;  %s1827_s11 = scalar_lea.vmem %s2020_s0, %s1220_s17  ;;  %v1520_v21 = vld [vmem:[#allocation3 + $0x58] sm:$0xff]   ;;  %s1218_s9 = sshll.u32 %s281_s24, 6 }
  0x3f   : > { %1349 = vmatprep.subr.bf16.mxu1 %v1516_v14  ;;  %v1503_v22 = vld [vmem:[%s2021_s1 + $0x74] ss:$8 sps:$4 sm:$0xff]   ;;  %v1522_v24 = vld [vmem:[#allocation3 + $0x60] sm:$0xff]   ;;  %v1505_v25 = vld [vmem:[%s2021_s1 + $0x70] ss:$8 sps:$4 sm:$0xff]   ;;  %s1927_s12 = scalar_lea.vmem [#allocation6], %s1218_s9 }
  0x40   : > { %v1521_v23 = vld [vmem:[#allocation3 + $0x18] sm:$0xff]   ;;  %v1836_v26 = vld [vmem:[%s1827_s11] sm:$0xff]   ;;  %v1524_v28 = vld [vmem:[#allocation3 + $0x68] sm:$0xff]   ;;  %s1299_s13 = sshll.u32 %s1640_s21, 10  ;;  %s1098_s14 = sshll.u32 %s1927_s12, 4  ;;  %s1969_s14 = int_to_ptr.vmem [resolvable:$true] %s1098_s14 }
  0x41   : > { %501 = vmatpush1.bf16.msra.mxu0 %v1490_v6  ;;  %v1523_v27 = vld [vmem:[#allocation3 + $0x20] sm:$0xff]   ;;  %v1841_v29 = vld [vmem:[%s1827_s11 + $0x8] sm:$0xff]   ;;  %v1846_v30 = vld [vmem:[%s1827_s11 + $0x10] sm:$0xff]   ;;  %s1967_s15 = scalar_lea.hbm %s2025_s5, %s1299_s13  ;;  %s1974_s7 = scalar_lea.sflag [#allocation5], %s281_s24 }
  0x42   : > { %502 = vmatprep.subr.bf16.mxu0 %v1491_v7  ;;  %1350 = vmatpush3.bf16.msra.mxu1 %v1517_v15  ;;  %v1851_v31 = vld [vmem:[%s1827_s11 + $0x18] sm:$0xff]   ;;  %v1856_v32 = vld [vmem:[%s1827_s11 + $0x20] sm:$0xff]   ;;  %v1861_v33 = vld [vmem:[%s1827_s11 + $0x28] sm:$0xff]   ;;  %s1566_s21 = scalar_lea.vmem %s1969_s14, 1024  ;;  %p2037_p10 = scmp.ne.s32.totalorder %s2030_s28, 0 }
  0x43   : > { %1351 = vmatprep.subr.bf16.mxu1 %v1518_v16  ;;  %v1866_v34 = vld [vmem:[%s1827_s11 + $0x30] sm:$0xff]   ;;  %v1871_v35 = vld [vmem:[%s1827_s11 + $0x38] sm:$0xff]   ;;  %v1525_v36 = vld [vmem:[#allocation3 + $0x28] sm:$0xff]   ;;  %p1567_p8 = scmp.ne.s32.totalorder %s1969_s14, %s1566_s21  ;;  %s1654_s10 = smov [#allocation6]  }
  0x44   : > { %v1526_v37 = vld [vmem:[#allocation3 + $0x70] sm:$0xff]   ;;  %v1528_v39 = vld [vmem:[#allocation3 + $0x78] sm:$0xff]   ;;  %v356_v44 = vld [vmem:[%s2022_s2] sm:$0x3]  ;;  %s1570_s8 = sshll.u32 %s1654_s10, 4  ;;  %s1571_s8 = int_to_ptr.vmem [resolvable:$false] %s1570_s8 }
  0x45   : > { %503 = vmatpush1.bf16.msra.mxu0 %v1493_v8  ;;  %v1527_v38 = vld [vmem:[#allocation3 + $0x30] sm:$0xff]   ;;  %v1529_v40 = vld [vmem:[#allocation3 + $0x38] sm:$0xff]   ;;  %v1877_v46 = vrot.slane %v356_v44, %v360_v43  ;;  %v1879_v47 = vrot.slane %v356_v44, %v364_v45  ;;  %p1568_p11 = pnand %p1567_p8, %p2037_p10  ;;  %s1572_s16 = scalar_lea.vmem %s1571_s8, 2048 }
  0x46   : > { %504 = vmatprep.subr.bf16.mxu0 %v1494_v9  ;;  %1352 = vmatpush3.bf16.msra.mxu1 %v1519_v20  ;;  %p1573_p1 = scmp.lt.s32.totalorder %s1969_s14, %s1571_s8  ;;  %p1574_p3 = scmp.lt.s32.totalorder %s1572_s16, %s1566_s21 }
  0x47   : > { %1353 = vmatprep.subr.bf16.mxu1 %v1520_v21  ;;  %p1569_p13 = pneg %p1568_p11 }
  0x48   : > { %p1575_p5 = por %p1574_p3, %p1573_p1 }
  0x49   : > { %505 = vmatpush1.bf16.msra.mxu0 %v1496_v10 }
  0x4a   : > { %506 = vmatprep.subr.bf16.mxu0 %v1497_v11  ;;  %1354 = vmatpush3.bf16.msra.mxu1 %v1521_v23  ;;  %p1576_p6 = pnand %p1575_p5, %p1569_p13 }
  0x4b   : > { %1355 = vmatprep.subr.bf16.mxu1 %v1522_v24 }
  0x4d   : > { %507 = vmatpush1.bf16.msra.mxu0 %v1499_v17 }
  0x4e   : > { %508 = vmatprep.subr.bf16.mxu0 %v1500_v18  ;;  %1356 = vmatpush3.bf16.msra.mxu1 %v1523_v27 }
  0x4f   : > { %1357 = vmatprep.subr.bf16.mxu1 %v1524_v28 }
  0x51   : > { %509 = vmatpush1.bf16.msra.mxu0 %v1502_v19 }
  0x52   : > { %510 = vmatprep.subr.bf16.mxu0 %v1503_v22  ;;  %1358 = vmatpush3.bf16.msra.mxu1 %v1525_v36 }
  0x53   : > { %1359 = vmatprep.subr.bf16.mxu1 %v1526_v37 }
  0x55   : > { %511 = vmatpush1.bf16.msra.mxu0 %v1505_v25 }
  0x56   : > { %1360 = vmatpush3.bf16.msra.mxu1 %v1527_v38 }
  0x57   : > { %1361 = vmatprep.subr.bf16.mxu1 %v1528_v39 }
  0x58   : > { %529 = vmatmul.mubr.bf16.vlgmr.msra.gmra.mrb[0].mxu0 %v1836_v26 }
  0x59   : > { %538 = vmatprep.mubr.bf16.mxu0 %v1653_v0 }
  0x5a   : > { %1362 = vmatpush3.bf16.msra.mxu1 %v1529_v40 }
  0x60   : > { %539 = vmatmul.mubr.bf16.gmra.mrb[4].mxu0 %v1841_v29 }
  0x61   : > { %548 = vmatprep.mubr.bf16.mxu0 %v1653_v0 }
  0x68   : > { %549 = vmatmul.mubr.bf16.gmra.mrb[8].mxu0 %v1846_v30 }
  0x69   : > { %558 = vmatprep.mubr.bf16.mxu0 %v1653_v0 }
  0x70   : > { %559 = vmatmul.mubr.bf16.gmra.mrb[12].mxu0 %v1851_v31 }
  0x71   : > { %568 = vmatprep.mubr.bf16.mxu0 %v1653_v0 }
  0x78   : > { %569 = vmatmul.mubr.bf16.gmra.mrb[16].mxu0 %v1856_v32 }
  0x79   : > { %578 = vmatprep.mubr.bf16.mxu0 %v1653_v0 }
  0x80   : > { %579 = vmatmul.mubr.bf16.gmra.mrb[20].mxu0 %v1861_v33 }
  0x81   : > { %588 = vmatprep.mubr.bf16.mxu0 %v1653_v0 }
  0x88   : > { %589 = vmatmul.mubr.bf16.gmra.mrb[24].mxu0 %v1866_v34 }
  0x89   : > { %598 = vmatprep.mubr.bf16.mxu0 %v1653_v0 }
  0x90   : > { %599 = vmatmul.mubr.bf16.gmra.mrb[28].mxu0 %v1871_v35 }
 0x12b   : > { %v530_v48 = vpop.f32.mrb[0].mxu0 }
 0x12c   : > { %v531_v49 = vadd.f32 %v530_v48, %v1877_v46  ;;  %v532_v50 = vpop.f32.mrb[1].mxu0 }
 0x12d   : > { %v533_v51 = vadd.f32 %v532_v50, %v1879_v47  ;;  %v534_v52 = vpop.f32.mrb[2].mxu0 }
 0x12e   : > { %v535_v53 = vadd.f32 %v534_v52, %v1877_v46  ;;  %v536_v54 = vpop.f32.mrb[3].mxu0  ;;  %v609_v56 = vmax.f32 %v531_v49, 0.0 }
 0x12f   : > { %v537_v55 = vadd.f32 %v536_v54, %v1879_v47  ;;  %v610_v58 = vmax.f32 %v533_v51, 0.0 }
 0x130   : > { %v611_v57 = vmax.f32 %v535_v53, 0.0 }
 0x131   : > { %v612_v59 = vmax.f32 %v537_v55, 0.0 }
 0x132   : > { %v657_v60 = vpack.c.bf16 %v611_v57, %v609_v56 }
 0x133   : > { %v540_v61 = vpop.f32.mrb[4].mxu0  ;;  %v658_v62 = vpack.c.bf16 %v612_v59, %v610_v58 }
 0x134   : > { %v541_v63 = vadd.f32 %v540_v61, %v1877_v46  ;;  %v542_v0 = vpop.f32.mrb[5].mxu0 }
 0x135   : > { %v543_v1 = vadd.f32 %v542_v0, %v1879_v47  ;;  %v544_v2 = vpop.f32.mrb[6].mxu0  ;;  %833 = vmatprep.mubr.bf16.mxu1 %v658_v62 }
 0x136   : > { %v545_v3 = vadd.f32 %v544_v2, %v1877_v46  ;;  %v546_v4 = vpop.f32.mrb[7].mxu0  ;;  %834 = vmatmul.mubr.bf16.vlgmr.msra.gmra.mrb[0].mxu1 %v657_v60  ;;  %v613_v6 = vmax.f32 %v541_v63, 0.0 }
 0x137   : > { %v547_v5 = vadd.f32 %v546_v4, %v1879_v47  ;;  %v614_v8 = vmax.f32 %v543_v1, 0.0 }
 0x138   : > { %v615_v7 = vmax.f32 %v545_v3, 0.0 }
 0x139   : > { %v616_v9 = vmax.f32 %v547_v5, 0.0 }
 0x13a   : > { %v659_v10 = vpack.c.bf16 %v615_v7, %v613_v6 }
 0x13b   : > { %v660_v11 = vpack.c.bf16 %v616_v9, %v614_v8  ;;  %v550_v12 = vpop.f32.mrb[8].mxu0 }
 0x13c   : > { %v551_v13 = vadd.f32 %v550_v12, %v1877_v46  ;;  %v552_v14 = vpop.f32.mrb[9].mxu0 }
 0x13d   : > { %v553_v15 = vadd.f32 %v552_v14, %v1879_v47  ;;  %v554_v16 = vpop.f32.mrb[10].mxu0  ;;  %841 = vmatprep.mubr.bf16.mxu1 %v660_v11 }
 0x13e   : > { %v555_v17 = vadd.f32 %v554_v16, %v1877_v46  ;;  %v556_v18 = vpop.f32.mrb[11].mxu0  ;;  %842 = vmatmul.mubr.bf16.gmra.mrb[4].mxu1 %v659_v10  ;;  %v617_v20 = vmax.f32 %v551_v13, 0.0 }
 0x13f   : > { %v557_v19 = vadd.f32 %v556_v18, %v1879_v47  ;;  %v618_v22 = vmax.f32 %v553_v15, 0.0 }
 0x140   : > { %v619_v21 = vmax.f32 %v555_v17, 0.0 }
 0x141   : > { %v620_v23 = vmax.f32 %v557_v19, 0.0 }
 0x142   : > { %v661_v24 = vpack.c.bf16 %v619_v21, %v617_v20 }
 0x143   : > { %v662_v25 = vpack.c.bf16 %v620_v23, %v618_v22  ;;  %v560_v27 = vpop.f32.mrb[12].mxu0 }
 0x144   : > { %v561_v28 = vadd.f32 %v560_v27, %v1877_v46  ;;  %v562_v36 = vpop.f32.mrb[13].mxu0 }
 0x145   : > { %v563_v37 = vadd.f32 %v562_v36, %v1879_v47  ;;  %v564_v38 = vpop.f32.mrb[14].mxu0  ;;  %849 = vmatprep.mubr.bf16.mxu1 %v662_v25 }
 0x146   : > { %v565_v39 = vadd.f32 %v564_v38, %v1877_v46  ;;  %v566_v40 = vpop.f32.mrb[15].mxu0  ;;  %850 = vmatmul.mubr.bf16.gmra.mrb[8].mxu1 %v661_v24  ;;  %v621_v42 = vmax.f32 %v561_v28, 0.0 }
 0x147   : > { %v567_v41 = vadd.f32 %v566_v40, %v1879_v47  ;;  %v622_v44 = vmax.f32 %v563_v37, 0.0 }
 0x148   : > { %v623_v43 = vmax.f32 %v565_v39, 0.0 }
 0x149   : > { %v624_v45 = vmax.f32 %v567_v41, 0.0 }
 0x14a   : > { %v663_v48 = vpack.c.bf16 %v623_v43, %v621_v42 }
 0x14b   : > { %v664_v49 = vpack.c.bf16 %v624_v45, %v622_v44  ;;  %v570_v50 = vpop.f32.mrb[16].mxu0 }
 0x14c   : > { %v571_v51 = vadd.f32 %v570_v50, %v1877_v46  ;;  %v572_v52 = vpop.f32.mrb[17].mxu0 }
 0x14d   : > { %v573_v53 = vadd.f32 %v572_v52, %v1879_v47  ;;  %v574_v54 = vpop.f32.mrb[18].mxu0  ;;  %857 = vmatprep.mubr.bf16.mxu1 %v664_v49 }
 0x14e   : > { %v575_v55 = vadd.f32 %v574_v54, %v1877_v46  ;;  %v576_v56 = vpop.f32.mrb[19].mxu0  ;;  %858 = vmatmul.mubr.bf16.gmra.mrb[12].mxu1 %v663_v48  ;;  %v625_v58 = vmax.f32 %v571_v51, 0.0 }
 0x14f   : > { %v577_v57 = vadd.f32 %v576_v56, %v1879_v47  ;;  %v626_v60 = vmax.f32 %v573_v53, 0.0  ;;  %v933_v53 = vunpack.c.l.bf16 %v1836_v26  ;;  %v934_v56 = vunpack.c.h.bf16 %v1836_v26 }
 0x150   : > { %v627_v59 = vmax.f32 %v575_v55, 0.0 }
 0x151   : > { %v628_v61 = vmax.f32 %v577_v57, 0.0 }
 0x152   : > { %v665_v62 = vpack.c.bf16 %v627_v59, %v625_v58  ;;  %v1919_v59 = vld [vmem:[%s2024_s4] ss:$0 sm:$0xff] }
 0x153   : > { %v666_v63 = vpack.c.bf16 %v628_v61, %v626_v60  ;;  %v580_v0 = vpop.f32.mrb[20].mxu0 }
 0x154   : > { %v581_v1 = vadd.f32 %v580_v0, %v1877_v46  ;;  %v582_v2 = vpop.f32.mrb[21].mxu0  ;;  %v935_v0 = vunpack.c.l.bf16 %v1841_v29 }
 0x155   : > { %v583_v3 = vadd.f32 %v582_v2, %v1879_v47  ;;  %v584_v4 = vpop.f32.mrb[22].mxu0  ;;  %865 = vmatprep.mubr.bf16.mxu1 %v666_v63 }
 0x156   : > { %v585_v5 = vadd.f32 %v584_v4, %v1877_v46  ;;  %v586_v6 = vpop.f32.mrb[23].mxu0  ;;  %866 = vmatmul.mubr.bf16.gmra.mrb[16].mxu1 %v665_v62  ;;  %v629_v8 = vmax.f32 %v581_v1, 0.0  ;;  %v936_v4 = vunpack.c.h.bf16 %v1841_v29 }
 0x157   : > { %v587_v7 = vadd.f32 %v586_v6, %v1879_v47  ;;  %v630_v10 = vmax.f32 %v583_v3, 0.0 }
 0x158   : > { %v631_v9 = vmax.f32 %v585_v5, 0.0 }
 0x159   : > { %v632_v11 = vmax.f32 %v587_v7, 0.0 }
 0x15a   : > { %v667_v12 = vpack.c.bf16 %v631_v9, %v629_v8 }
 0x15b   : > { %v668_v13 = vpack.c.bf16 %v632_v11, %v630_v10  ;;  %v590_v14 = vpop.f32.mrb[24].mxu0 }
 0x15c   : > { %v591_v15 = vadd.f32 %v590_v14, %v1877_v46  ;;  %v592_v16 = vpop.f32.mrb[25].mxu0 }
 0x15d   : > { %v593_v17 = vadd.f32 %v592_v16, %v1879_v47  ;;  %v594_v18 = vpop.f32.mrb[26].mxu0  ;;  %873 = vmatprep.mubr.bf16.mxu1 %v668_v13  ;;  %v938_v16 = vunpack.c.h.bf16 %v1846_v30 }
 0x15e   : > { %v595_v19 = vadd.f32 %v594_v18, %v1877_v46  ;;  %v596_v20 = vpop.f32.mrb[27].mxu0  ;;  %874 = vmatmul.mubr.bf16.gmra.mrb[20].mxu1 %v667_v12  ;;  %v633_v22 = vmax.f32 %v591_v15, 0.0  ;;  %v937_v12 = vunpack.c.l.bf16 %v1846_v30 }
 0x15f   : > { %v597_v21 = vadd.f32 %v596_v20, %v1879_v47  ;;  %v634_v24 = vmax.f32 %v593_v17, 0.0 }
 0x160   : > { %v635_v23 = vmax.f32 %v595_v19, 0.0 }
 0x161   : > { %v636_v25 = vmax.f32 %v597_v21, 0.0 }
 0x162   : > { %v669_v27 = vpack.c.bf16 %v635_v23, %v633_v22 }
 0x163   : > { %v670_v28 = vpack.c.bf16 %v636_v25, %v634_v24  ;;  %v600_v36 = vpop.f32.mrb[28].mxu0  ;;  %v939_v24 = vunpack.c.l.bf16 %v1851_v31 }
 0x164   : > { %v601_v37 = vadd.f32 %v600_v36, %v1877_v46  ;;  %v602_v38 = vpop.f32.mrb[29].mxu0 }
 0x165   : > { %v603_v39 = vadd.f32 %v602_v38, %v1879_v47  ;;  %v604_v40 = vpop.f32.mrb[30].mxu0  ;;  %881 = vmatprep.mubr.bf16.mxu1 %v670_v28 }
 0x166   : > { %v605_v41 = vadd.f32 %v604_v40, %v1877_v46  ;;  %v606_v42 = vpop.f32.mrb[31].mxu0  ;;  %882 = vmatmul.mubr.bf16.gmra.mrb[24].mxu1 %v669_v27  ;;  %v637_v44 = vmax.f32 %v601_v37, 0.0  ;;  %v940_v37 = vunpack.c.h.bf16 %v1851_v31 }
 0x167   : > { %v607_v43 = vadd.f32 %v606_v42, %v1879_v47  ;;  %v638_v48 = vmax.f32 %v603_v39, 0.0 }
 0x168   : > { %v639_v45 = vmax.f32 %v605_v41, 0.0 }
 0x169   : > { %v640_v49 = vmax.f32 %v607_v43, 0.0 }
 0x16a   : > { %v671_v50 = vpack.c.bf16 %v639_v45, %v637_v44  ;;  %v941_v44 = vunpack.c.l.bf16 %v1856_v32 }
 0x16b   : > { %v672_v51 = vpack.c.bf16 %v640_v49, %v638_v48 }
 0x16d   : > { %889 = vmatprep.mubr.bf16.mxu1 %v672_v51  ;;  %v942_v51 = vunpack.c.h.bf16 %v1856_v32 }
 0x16e   : > { %890 = vmatmul.mubr.bf16.gmra.mrb[28].mxu1 %v671_v50 }
 0x209   : > { %v1363_v52 = vpop.f32.mrb[0].mxu1 }
 0x20a   : > { %v1364_v54 = vpop.f32.mrb[1].mxu1 }
 0x20b   : > { %v1365_v55 = vadd.f32 %v1364_v54, %v1363_v52  ;;  %v1366_v46 = vpop.f32.mrb[2].mxu1 }
 0x20c   : > { %v1367_v57 = vpop.f32.mrb[3].mxu1 }
 0x20d   : > { %v965_v47 = vadd.f32 %v1365_v55, %v933_v53  ;;  %v1368_v58 = vadd.f32 %v1367_v57, %v1366_v46  ;;  %v943_v57 = vunpack.c.l.bf16 %v1861_v33 }
 0x20f   : > { %v966_v60 = vadd.f32 %v1368_v58, %v934_v56  ;;  %v988_v61 = vadd.f32 %v1919_v59, %v965_v47 }
 0x211   : > { %v989_v62 = vadd.f32 %v1919_v59, %v966_v60  ;;  %v1369_v63 = vpop.f32.mrb[4].mxu1 }
 0x212   : > { %v1370_v26 = vpop.f32.mrb[5].mxu1 }
 0x213   : > { %v1303_v1 = vpack.c.bf16 %v989_v62, %v988_v61  ;;  %v1371_v2 = vadd.f32 %v1370_v26, %v1369_v63  ;;  %v1372_v3 = vpop.f32.mrb[6].mxu1  ;;  %v944_v62 = vunpack.c.h.bf16 %v1861_v33 }
 0x214   : > { %v1373_v5 = vpop.f32.mrb[7].mxu1 }
 0x215   : > { %1304 = vst [vmem:[%s1927_s12] sm:$0xff] %v1303_v1   ;;  %v967_v6 = vadd.f32 %v1371_v2, %v935_v0  ;;  %v1374_v7 = vadd.f32 %v1373_v5, %v1372_v3 }
 0x217   : > { %v968_v8 = vadd.f32 %v1374_v7, %v936_v4  ;;  %v990_v9 = vadd.f32 %v1919_v59, %v967_v6  ;;  %v945_v4 = vunpack.c.l.bf16 %v1866_v34 }
 0x219   : > { %v991_v10 = vadd.f32 %v1919_v59, %v968_v8  ;;  %v1375_v11 = vpop.f32.mrb[8].mxu1 }
 0x21a   : > { %v1376_v13 = vpop.f32.mrb[9].mxu1 }
 0x21b   : > { %v1308_v14 = vpack.c.bf16 %v991_v10, %v990_v9  ;;  %v1377_v15 = vadd.f32 %v1376_v13, %v1375_v11  ;;  %v1378_v29 = vpop.f32.mrb[10].mxu1  ;;  %v946_v9 = vunpack.c.h.bf16 %v1866_v34 }
 0x21c   : > { %v1379_v17 = vpop.f32.mrb[11].mxu1 }
 0x21d   : > { %1340 = vst [vmem:[%s1927_s12 + $0x8] sm:$0xff] %v1308_v14   ;;  %v969_v18 = vadd.f32 %v1377_v15, %v937_v12  ;;  %v1380_v19 = vadd.f32 %v1379_v17, %v1378_v29  ;;  %v947_v29 = vunpack.c.l.bf16 %v1871_v35 }
 0x21f   : > { %v970_v20 = vadd.f32 %v1380_v19, %v938_v16  ;;  %v992_v21 = vadd.f32 %v1919_v59, %v969_v18  ;;  %v948_v19 = vunpack.c.h.bf16 %v1871_v35 }
 0x221   : > { %v993_v22 = vadd.f32 %v1919_v59, %v970_v20  ;;  %v1381_v23 = vpop.f32.mrb[12].mxu1 }
 0x222   : > { %v1382_v25 = vpop.f32.mrb[13].mxu1 }
 0x223   : > { %v1313_v27 = vpack.c.bf16 %v993_v22, %v992_v21  ;;  %v1383_v28 = vadd.f32 %v1382_v25, %v1381_v23  ;;  %v1384_v36 = vpop.f32.mrb[14].mxu1 }
 0x224   : > { %v1385_v30 = vpop.f32.mrb[15].mxu1 }
 0x225   : > { %1341 = vst [vmem:[%s1927_s12 + $0x10] sm:$0xff] %v1313_v27   ;;  %v971_v38 = vadd.f32 %v1383_v28, %v939_v24  ;;  %v1386_v39 = vadd.f32 %v1385_v30, %v1384_v36 }
 0x227   : > { %v972_v40 = vadd.f32 %v1386_v39, %v940_v37  ;;  %v994_v41 = vadd.f32 %v1919_v59, %v971_v38 }
 0x229   : > { %v995_v42 = vadd.f32 %v1919_v59, %v972_v40  ;;  %v1387_v43 = vpop.f32.mrb[16].mxu1 }
 0x22a   : > { %v1388_v45 = vpop.f32.mrb[17].mxu1 }
 0x22b   : > { %v1318_v48 = vpack.c.bf16 %v995_v42, %v994_v41  ;;  %v1389_v49 = vadd.f32 %v1388_v45, %v1387_v43  ;;  %v1390_v50 = vpop.f32.mrb[18].mxu1 }
 0x22c   : > { %v1391_v31 = vpop.f32.mrb[19].mxu1 }
 0x22d   : > { %1342 = vst [vmem:[%s1927_s12 + $0x18] sm:$0xff] %v1318_v48   ;;  %v973_v52 = vadd.f32 %v1389_v49, %v941_v44  ;;  %v1392_v53 = vadd.f32 %v1391_v31, %v1390_v50 }
 0x22f   : > { %v974_v54 = vadd.f32 %v1392_v53, %v942_v51  ;;  %v996_v55 = vadd.f32 %v1919_v59, %v973_v52 }
 0x231   : > { %v997_v46 = vadd.f32 %v1919_v59, %v974_v54  ;;  %v1393_v56 = vpop.f32.mrb[20].mxu1 }
 0x232   : > { %v1394_v47 = vpop.f32.mrb[21].mxu1 }
 0x233   : > { %v1323_v58 = vpack.c.bf16 %v997_v46, %v996_v55  ;;  %v1395_v60 = vadd.f32 %v1394_v47, %v1393_v56  ;;  %v1396_v61 = vpop.f32.mrb[22].mxu1 }
 0x234   : > { %v1397_v32 = vpop.f32.mrb[23].mxu1 }
 0x235   : > { %1343 = vst [vmem:[%s1927_s12 + $0x20] sm:$0xff] %v1323_v58   ;;  %v975_v63 = vadd.f32 %v1395_v60, %v943_v57  ;;  %v1398_v0 = vadd.f32 %v1397_v32, %v1396_v61 }
 0x237   : > { %v976_v26 = vadd.f32 %v1398_v0, %v944_v62  ;;  %v998_v1 = vadd.f32 %v1919_v59, %v975_v63 }
 0x239   : > { %v999_v2 = vadd.f32 %v1919_v59, %v976_v26  ;;  %v1399_v3 = vpop.f32.mrb[24].mxu1 }
 0x23a   : > { %v1400_v5 = vpop.f32.mrb[25].mxu1 }
 0x23b   : > { %v1328_v6 = vpack.c.bf16 %v999_v2, %v998_v1  ;;  %v1401_v7 = vadd.f32 %v1400_v5, %v1399_v3  ;;  %v1402_v8 = vpop.f32.mrb[26].mxu1 }
 0x23c   : > { %v1403_v33 = vpop.f32.mrb[27].mxu1 }
 0x23d   : > { %1344 = vst [vmem:[%s1927_s12 + $0x28] sm:$0xff] %v1328_v6   ;;  %v977_v10 = vadd.f32 %v1401_v7, %v945_v4  ;;  %v1404_v11 = vadd.f32 %v1403_v33, %v1402_v8 }
 0x23f   : > { %v978_v12 = vadd.f32 %v1404_v11, %v946_v9  ;;  %v1000_v13 = vadd.f32 %v1919_v59, %v977_v10 }
 0x241   : > { %v1001_v14 = vadd.f32 %v1919_v59, %v978_v12  ;;  %v1405_v15 = vpop.f32.mrb[28].mxu1 }
 0x242   : > { %v1406_v16 = vpop.f32.mrb[29].mxu1 }
 0x243   : > { %v1333_v17 = vpack.c.bf16 %v1001_v14, %v1000_v13  ;;  %v1407_v18 = vadd.f32 %v1406_v16, %v1405_v15  ;;  %v1408_v34 = vpop.f32.mrb[30].mxu1 }
 0x244   : > { %v1409_v20 = vpop.f32.mrb[31].mxu1 }
 0x245   : > { %1345 = vst [vmem:[%s1927_s12 + $0x30] sm:$0xff] %v1333_v17   ;;  %v979_v21 = vadd.f32 %v1407_v18, %v947_v29  ;;  %v1410_v22 = vadd.f32 %v1409_v20, %v1408_v34 }
 0x247   : > { %v980_v23 = vadd.f32 %v1410_v22, %v948_v19  ;;  %v1002_v24 = vadd.f32 %v1919_v59, %v979_v21 }
 0x249   : > { %v1003_v25 = vadd.f32 %v1919_v59, %v980_v23 }
 0x24b   : > { %v1338_v35 = vpack.c.bf16 %v1003_v25, %v1002_v24 }
 0x24d   : > { %1346 = vst [vmem:[%s1927_s12 + $0x38] sm:$0xff] %v1338_v35  }
 0x24e   : > { %1579 = shalt.err (!%p1576_p6)
}
 0x24f   : > { %s1580_s17 = scalar_lea.hbm %s1967_s15, 1024  ;;  %s1584_s27 = scalar_lea.hbm %s2025_s5, 4096 }
 0x250   : > { %p1581_p7 = scmp.ne.s32.totalorder %s1967_s15, %s1580_s17  ;;  %p1585_p0 = scmp.lt.u32.totalorder %s1967_s15, %s2025_s5 }
 0x251   : > { %p1586_p2 = scmp.lt.u32.totalorder %s1584_s27, %s1580_s17  ;;  %p1588_p8 = scmp.lt.u32.totalorder %s1580_s17, %s1967_s15 }
 0x252   : > { %p1582_p9 = pnand %p1581_p7, %p2037_p10 }
 0x253   : > { %p1587_p4 = por %p1586_p2, %p1585_p0 }
 0x254   : > { %p1583_p12 = pneg %p1582_p9 }
 0x255   : > { %p1589_p11 = por %p1588_p8, %p1587_p4 }
 0x257   : > { %p1590_p13 = pnand %p1589_p11, %p1583_p12 }
 0x259   : > { %1593 = shalt.err (!%p1590_p13)
}
 0x25a   : > { %s1655_s13 = smov 64   ;;  %s1656_s29 = smov 4  }
 0x25b   : > { %1415 = dma.vmem_to_hbm [thread:$0]  (%p2037_p10), %s1969_s14, 1024, %s1967_s15, %s1974_s7, %s1655_s13, %s1655_s13, %s1656_s29  }
 0x25c PF: > { %p1427_p1 = scmp.ge.s32.totalorder %s1648_s23, 2  ;;  %s1113_s11 = sand.u32 1, %s1628_s18  }
 0x25d   : > { %p2038_p3 = scmp.ne.s32.totalorder %s2031_s30, 0  ;;  %s1114_s21 = scalar_lea.sflag [#allocation5], %s1113_s11 }
 0x25f   : > { %p1422_p5 = pnand %p1427_p1, %p2038_p3 }
 0x261   : > { %1623 = dma.done.wait (!%p1422_p5), %s1114_s21, 1024  }
 0x262   : > { %1625 = vsyncadd (!%p1422_p5), %s1114_s21, 4294966272  ;;  %s19_s23 = sadd.s32 1, %s1648_s23   ;;  %s2039_s18 = smov %s1632_s19 }
 0x263   : > { %p16_p6 = scmp.ge.s32.totalorder %s19_s23, 6   ;;  %s2040_s19 = smov %s1636_s20 }
 0x264   : > { %s2041_s20 = smov %s1740_s6  ;;  %s2042_s21 = smov %s1644_s22 }
 0x265   : > { %s2043_s22 = smov %s2045_s26  ;;  %18 = sbr.rel (!%p16_p6) target bundleno = 5 (0x5), region = 95 }
 0x26c   :  { %1119 = vsyncpa [#allocation4], 1 }
 0x26d   :  { %1121 = vsyncpa [#allocation4 + $0x1], 1 }
 0x26e   :  { %1122 = vsyncpa [#allocation5], 1 }
 0x26f   :  { %1124 = vsyncpa [#allocation5 + $0x1], 1 }

</bundles_post_ra>
